<compile_context>
chip_gen: v7x
topology: tpu7x:2x2x1
jax: 0.10.0
libtpu: 0.0.40
codegen_flags: <defaults>
</compile_context>

<pallas_src>
import functools
import numpy as np
import jax
import jax.numpy as jnp
from jax.experimental import pallas as pl
from jax.experimental.pallas import tpu as pltpu


def _round_up(x, m):
    return ((x + m - 1) // m) * m


def _dot_bt(a, b):
    # a: (M, K), b: (N, K) -> (M, N), contracting the minor dim of both operands.
    # Maps straight onto the MXU (same pattern as flash-attention QK^T), so no
    # explicit transpose of the big activation tile is ever materialized.
    return jax.lax.dot_general(a, b, (((1,), (1,)), ((), ())),
                               preferred_element_type=jnp.float32)


def sfm_kernel(w0_ref, mk_ref, w_ref, v_ref, out_ref, *, order, num_field, d):
    Mk = mk_ref[...]   # (num_field*d, F*d)   M (x) I_d
    Wb = w_ref[...]    # (tb, F)              gathered first-order weights, natural layout
    Vb = v_ref[...]    # (tb, F*d)            gathered embeddings, natural layout
    F = Wb.shape[1]

    # self.M @ V for the whole tile as ONE MXU matmul on the Kronecker-lifted M:
    #   MV[m*d + k, b] = sum_f M[m, f] * V[b, f, k]
    # Result is already batch-on-lanes (the layout the DP and outputs want).
    MV = _dot_bt(Mk, Vb)                                   # (num_field*d, tb) f32

    # Put the small first-order slab onto lanes via an identity matmul (MXU is idle);
    # avoids any XLA-side transpose of w and any awkward in-kernel XLU transpose.
    rows = jax.lax.broadcasted_iota(jnp.int32, (F, F), 0)
    cols = jax.lax.broadcasted_iota(jnp.int32, (F, F), 1)
    eyeF = (rows == cols).astype(Wb.dtype)
    Wt = _dot_bt(eyeF, Wb)                                 # (F, tb) f32 == W.T

    w_sum = jnp.sum(Wt, axis=0, keepdims=True)             # (1, tb)
    w_sq = jnp.sum(Wt * Wt, axis=0, keepdims=True)         # (1, tb)  per-sample reg_w

    # Fused ANOVA-kernel DP over fields on full-lane-width (d, tb) slabs:
    #   A[t]   : sum over t-subsets of all fields of their elementwise products  (for y)
    #   Asq[t] : same DP on MV**2 over fields 0..num_field-2                     (for reg_v)
    # Pruned: A[t] has no terms until field t-1 has been seen (skip t > j+1), and
    # A[0] == 1 so the t==1 update is a pure add (no multiply, no ones slab).
    # TODO(synk): for tb >= 1024 restructure this DP as an inner fori_loop over
    # 128/256-lane chunks of MV so the A/Asq state stays register-resident.
    A = [None] * (order + 1)
    Asq = [None] * (order + 1)
    for j in range(num_field):
        vj = MV[j * d:(j + 1) * d, :]                      # (d, tb) static slice
        for t in range(min(order, j + 1), 1, -1):          # high->low: uses old A[t-1]
            term = vj * A[t - 1]
            A[t] = term if A[t] is None else A[t] + term
        A[1] = vj if A[1] is None else A[1] + vj
        if j < num_field - 1:                              # reg_v excludes the last field
            vj2 = vj * vj
            for t in range(min(order, j + 1), 1, -1):
                term = vj2 * Asq[t - 1]
                Asq[t] = term if Asq[t] is None else Asq[t] + term
            Asq[1] = vj2 if Asq[1] is None else Asq[1] + vj2

    inter = None
    for t in range(2, order + 1):
        if A[t] is not None:
            inter = A[t] if inter is None else inter + A[t]

    w0 = w0_ref[0]
    y_row = w0 + w_sum
    if inter is not None:
        y_row = y_row + jnp.sum(inter, axis=0, keepdims=True)
    if Asq[order] is not None:
        regv_row = jnp.sum(Asq[order], axis=0, keepdims=True)
    else:
        regv_row = jnp.zeros_like(w_sum)

    # Fused lane-dense (3, tb) output block: rows {y, reg_w, reg_v}.
    out_ref[0:1, :] = y_row
    out_ref[1:2, :] = w_sq
    # TODO(synk): `trace` used by FM.regularization is not defined in the reference
    # snippet; it is assumed here to be the L2 sum-of-squares.
    out_ref[2:3, :] = regv_row


def sfm_forward(x, w_table, V_table, w0, M, *, order, alpha, beta,
                tb=None, input_dtype=jnp.float32):
    B, F = x.shape
    n, d = V_table.shape
    num_field = M.shape[0]

    # Lane-dense batch tile: multiple of 128, capped at 512 (keeps the DP state
    # vreg-resident on v5e/v6e/v7x), and sized so the grid has >=8 steps when the
    # batch allows it (pipeline overlap + several steps per v7x TensorCore).
    if tb is None:
        tb = _round_up(max(1, -(-B // 8)), 128)
    tb = max(128, _round_up(tb, 128))
    tb = min(tb, 512, _round_up(B, 128))
    num_tiles = -(-B // tb)
    Bp = num_tiles * tb

    # Pad the int32 index matrix (cheap) instead of the gathered float activations;
    # padded rows produce real (garbage) values and are sliced off below.
    if Bp != B:
        x = jnp.pad(x, ((0, Bp - B), (0, 0)))

    # Embedding gathers stay in XLA, in natural batch-major layout: no extra HBM
    # relayout pass.  The (Bp, F, d) -> (Bp, F*d) reshape is a free contiguous view.
    # TODO(synk): `input_dtype=jnp.bfloat16` halves activation DMA bytes but may
    # exceed 1e-3 tolerance for order-3 products; kept f32 by default.
    w_feat = w_table[x].astype(input_dtype)                        # (Bp, F)
    v_feat = V_table[x].reshape(Bp, F * d).astype(input_dtype)     # (Bp, F*d)
    M_kron = jnp.kron(M.astype(jnp.float32),
                      jnp.eye(d, dtype=jnp.float32)).astype(input_dtype)

    kernel = functools.partial(sfm_kernel, order=order, num_field=num_field, d=d)
    out = pl.pallas_call(
        kernel,
        out_shape=jax.ShapeDtypeStruct((3, Bp), jnp.float32),
        grid=(num_tiles,),
        in_specs=[
            pl.BlockSpec(memory_space=pltpu.MemorySpace.SMEM),          # w0 scalar (1,)
            pl.BlockSpec((num_field * d, F * d), lambda i: (0, 0)),     # M (x) I_d, replicated
            pl.BlockSpec((tb, F), lambda i: (i, 0)),                    # w tile, natural layout
            pl.BlockSpec((tb, F * d), lambda i: (i, 0)),                # V tile, natural layout
        ],
        out_specs=pl.BlockSpec((3, tb), lambda i: (0, i)),              # fused {y, regw, regv}
        compiler_params=pltpu.CompilerParams(dimension_semantics=("parallel",)),
    )(w0.astype(jnp.float32), M_kron, w_feat, v_feat)

    y = out[0, :B]
    reg = alpha * jnp.sum(out[1, :B]) + beta * jnp.sum(out[2, :B])
    return y, reg


# ---------------- numpy reference mirroring the PyTorch code ----------------
def _create_mask(Min):
    Min = np.asarray(Min, dtype=bool)
    R, C = Min.shape
    rows = np.nonzero(Min[:-1].reshape(-1))[0] // C
    return rows[None, :] <= np.arange(R - 1)[:, None]


def sfm_reference(x, w_table, V_table, w0, M, order):
    x = np.asarray(x)
    w_table = np.asarray(w_table)
    V_table = np.asarray(V_table)
    w0 = float(np.asarray(w0)[0])
    M = np.asarray(M)
    w = w_table[x]                                  # (B, F)
    V = V_table[x]                                  # (B, F, d)
    MV = np.einsum("mf,bfd->bmd", M, V)             # (B, num_field, d) == M @ V
    num_field = M.shape[0]
    Vc = MV[:, :-1]
    V0 = MV[:, 1:]
    y = w0 + np.sum(w, axis=1)
    mask = _create_mask(np.eye(num_field))
    for t in range(2, order + 1):
        Vp = V0[:, :, None, :] * Vc[:, None, :, :]  # unsqueeze(-2) * unsqueeze(-3)
        W = np.sum(Vp[:, mask], axis=-1)            # inference(V[:, mask])
        y = y + np.sum(W, axis=-1)
        M_minus = mask.copy()
        M_minus[-1, :] = False
        V0 = V0[:, 1:]
        Vc = Vp[:, M_minus]
        mask = _create_mask(M_minus)
    return y, w, Vc


if __name__ == "__main__":
    B, F, n, d, num_field, order = 1000, 8, 32, 8, 8, 3
    alpha, beta = 1e-3, 1e-3

    key = jax.random.PRNGKey(0)
    k1, k2, k3, k4, k5 = jax.random.split(key, 5)
    x = jax.random.randint(k1, (B, F), 0, n, dtype=jnp.int32)
    w_table = 0.1 * jax.random.normal(k2, (n,), jnp.float32)       # self.w embedding
    V_table = 0.1 * jax.random.normal(k3, (n, d), jnp.float32)     # self.V embedding
    w0 = 0.01 * jax.random.normal(k4, (1,), jnp.float32)           # nn.init.normal_(w0,0,0.01)
    M = jax.random.normal(k5, (num_field, F), jnp.float32)         # self.M

    y, reg = sfm_forward(x, w_table, V_table, w0, M,
                         order=order, alpha=alpha, beta=beta)
    jax.block_until_ready((y, reg))

    y_ref, w_np, V_final = sfm_reference(x, w_table, V_table, w0, M, order)
    reg_ref = alpha * np.sum(w_np ** 2) + beta * np.sum(V_final ** 2)
    assert np.allclose(np.asarray(y), y_ref, rtol=1e-3, atol=1e-3), (
        np.max(np.abs(np.asarray(y) - y_ref)))
    assert np.allclose(float(reg), reg_ref, rtol=2e-3, atol=1e-5), (float(reg), reg_ref)
    print("KERNEL_OK")
</pallas_src>

<mosaic_0001>
module attributes {stable_mosaic.version = 11 : i64} {
  func.func @sfm_kernel(%arg0: i32, %arg1: memref<1xf32, #tpu.memory_space<smem>>, %arg2: memref<64x64xf32, #tpu.memory_space<vmem>>, %arg3: memref<128x8xf32, #tpu.memory_space<vmem>>, %arg4: memref<128x64xf32, #tpu.memory_space<vmem>>, %arg5: memref<3x128xf32, #tpu.memory_space<vmem>>) attributes {dimension_semantics = [#tpu.dimension_semantics<parallel>], iteration_bounds = array<i64: 8>, scalar_prefetch = 0 : i64, scratch_operands = 0 : i64, tpu.core_type = #tpu.core_type<tc>, window_params = [{transform_indices = @transform_0, window_bounds = array<i64: 1>}, {pipeline_mode = #tpu.pipeline_mode<synchronous>, transform_indices = @transform_1, window_bounds = array<i64: 64, 64>}, {transform_indices = @transform_2, window_bounds = array<i64: 128, 8>}, {transform_indices = @transform_3, window_bounds = array<i64: 128, 64>}, {transform_indices = @transform_4, window_bounds = array<i64: 3, 128>}]} {
    %c0 = arith.constant 0 : index
    %c0_0 = arith.constant 0 : index
    %0 = vector.load %arg2[%c0, %c0_0] : memref<64x64xf32, #tpu.memory_space<vmem>>, vector<64x64xf32>
    %c0_1 = arith.constant 0 : index
    %c0_2 = arith.constant 0 : index
    %1 = vector.load %arg3[%c0_1, %c0_2] : memref<128x8xf32, #tpu.memory_space<vmem>>, vector<128x8xf32>
    %c0_3 = arith.constant 0 : index
    %c0_4 = arith.constant 0 : index
    %2 = vector.load %arg4[%c0_3, %c0_4] : memref<128x64xf32, #tpu.memory_space<vmem>>, vector<128x64xf32>
    %cst = arith.constant dense<0.000000e+00> : vector<64x128xf32>
    %3 = tpu.matmul %0, %2, %cst {dimension_numbers = #tpu.dot_dimension_numbers<[1], [1], [0], [0], [0, 0, 1, 0], [], []>} : vector<64x64xf32>, vector<128x64xf32>, vector<64x128xf32> -> vector<64x128xf32>
    %4 = tpu.iota {dimensions = array<i32: 0>} : vector<8x8xi32>
    %5 = tpu.iota {dimensions = array<i32: 1>} : vector<8x8xi32>
    %6 = arith.cmpi eq, %4, %5 : vector<8x8xi32>
    %7 = arith.extui %6 : vector<8x8xi1> to vector<8x8xi32>
    %8 = arith.sitofp %7 : vector<8x8xi32> to vector<8x8xf32>
    %cst_5 = arith.constant dense<0.000000e+00> : vector<8x128xf32>
    %9 = tpu.matmul %8, %1, %cst_5 {dimension_numbers = #tpu.dot_dimension_numbers<[1], [1], [0], [0], [0, 0, 1, 0], [], []>} : vector<8x8xf32>, vector<128x8xf32>, vector<8x128xf32> -> vector<8x128xf32>
    %cst_6 = arith.constant dense<0.000000e+00> : vector<128xf32>
    %10 = vector.multi_reduction <add>, %9, %cst_6 [0] : vector<8x128xf32> to vector<128xf32>
    %11 = vector.shape_cast %10 : vector<128xf32> to vector<1x128xf32>
    %12 = arith.mulf %9, %9 : vector<8x128xf32>
    %cst_7 = arith.constant dense<0.000000e+00> : vector<128xf32>
    %13 = vector.multi_reduction <add>, %12, %cst_7 [0] : vector<8x128xf32> to vector<128xf32>
    %14 = vector.shape_cast %13 : vector<128xf32> to vector<1x128xf32>
    %15 = vector.extract_strided_slice %3 {offsets = [0, 0], sizes = [8, 128], strides = [1, 1]} : vector<64x128xf32> to vector<8x128xf32>
    %16 = arith.mulf %15, %15 : vector<8x128xf32>
    %17 = vector.extract_strided_slice %3 {offsets = [8, 0], sizes = [8, 128], strides = [1, 1]} : vector<64x128xf32> to vector<8x128xf32>
    %18 = arith.mulf %17, %15 : vector<8x128xf32>
    %19 = arith.addf %15, %17 : vector<8x128xf32>
    %20 = arith.mulf %17, %17 : vector<8x128xf32>
    %21 = arith.mulf %20, %16 : vector<8x128xf32>
    %22 = arith.addf %16, %20 : vector<8x128xf32>
    %23 = vector.extract_strided_slice %3 {offsets = [16, 0], sizes = [8, 128], strides = [1, 1]} : vector<64x128xf32> to vector<8x128xf32>
    %24 = arith.mulf %23, %18 : vector<8x128xf32>
    %25 = arith.mulf %23, %19 : vector<8x128xf32>
    %26 = arith.addf %18, %25 : vector<8x128xf32>
    %27 = arith.addf %19, %23 : vector<8x128xf32>
    %28 = arith.mulf %23, %23 : vector<8x128xf32>
    %29 = arith.mulf %28, %21 : vector<8x128xf32>
    %30 = arith.mulf %28, %22 : vector<8x128xf32>
    %31 = arith.addf %21, %30 : vector<8x128xf32>
    %32 = arith.addf %22, %28 : vector<8x128xf32>
    %33 = vector.extract_strided_slice %3 {offsets = [24, 0], sizes = [8, 128], strides = [1, 1]} : vector<64x128xf32> to vector<8x128xf32>
    %34 = arith.mulf %33, %26 : vector<8x128xf32>
    %35 = arith.addf %24, %34 : vector<8x128xf32>
    %36 = arith.mulf %33, %27 : vector<8x128xf32>
    %37 = arith.addf %26, %36 : vector<8x128xf32>
    %38 = arith.addf %27, %33 : vector<8x128xf32>
    %39 = arith.mulf %33, %33 : vector<8x128xf32>
    %40 = arith.mulf %39, %31 : vector<8x128xf32>
    %41 = arith.addf %29, %40 : vector<8x128xf32>
    %42 = arith.mulf %39, %32 : vector<8x128xf32>
    %43 = arith.addf %31, %42 : vector<8x128xf32>
    %44 = arith.addf %32, %39 : vector<8x128xf32>
    %45 = vector.extract_strided_slice %3 {offsets = [32, 0], sizes = [8, 128], strides = [1, 1]} : vector<64x128xf32> to vector<8x128xf32>
    %46 = arith.mulf %45, %37 : vector<8x128xf32>
    %47 = arith.addf %35, %46 : vector<8x128xf32>
    %48 = arith.mulf %45, %38 : vector<8x128xf32>
    %49 = arith.addf %37, %48 : vector<8x128xf32>
    %50 = arith.addf %38, %45 : vector<8x128xf32>
    %51 = arith.mulf %45, %45 : vector<8x128xf32>
    %52 = arith.mulf %51, %43 : vector<8x128xf32>
    %53 = arith.addf %41, %52 : vector<8x128xf32>
    %54 = arith.mulf %51, %44 : vector<8x128xf32>
    %55 = arith.addf %43, %54 : vector<8x128xf32>
    %56 = arith.addf %44, %51 : vector<8x128xf32>
    %57 = vector.extract_strided_slice %3 {offsets = [40, 0], sizes = [8, 128], strides = [1, 1]} : vector<64x128xf32> to vector<8x128xf32>
    %58 = arith.mulf %57, %49 : vector<8x128xf32>
    %59 = arith.addf %47, %58 : vector<8x128xf32>
    %60 = arith.mulf %57, %50 : vector<8x128xf32>
    %61 = arith.addf %49, %60 : vector<8x128xf32>
    %62 = arith.addf %50, %57 : vector<8x128xf32>
    %63 = arith.mulf %57, %57 : vector<8x128xf32>
    %64 = arith.mulf %63, %55 : vector<8x128xf32>
    %65 = arith.addf %53, %64 : vector<8x128xf32>
    %66 = arith.mulf %63, %56 : vector<8x128xf32>
    %67 = arith.addf %55, %66 : vector<8x128xf32>
    %68 = vector.extract_strided_slice %3 {offsets = [48, 0], sizes = [8, 128], strides = [1, 1]} : vector<64x128xf32> to vector<8x128xf32>
    %69 = arith.mulf %68, %61 : vector<8x128xf32>
    %70 = arith.addf %59, %69 : vector<8x128xf32>
    %71 = arith.mulf %68, %62 : vector<8x128xf32>
    %72 = arith.addf %61, %71 : vector<8x128xf32>
    %73 = arith.addf %62, %68 : vector<8x128xf32>
    %74 = arith.mulf %68, %68 : vector<8x128xf32>
    %75 = arith.mulf %74, %67 : vector<8x128xf32>
    %76 = arith.addf %65, %75 : vector<8x128xf32>
    %77 = vector.extract_strided_slice %3 {offsets = [56, 0], sizes = [8, 128], strides = [1, 1]} : vector<64x128xf32> to vector<8x128xf32>
    %78 = arith.mulf %77, %72 : vector<8x128xf32>
    %79 = arith.addf %70, %78 : vector<8x128xf32>
    %80 = arith.mulf %77, %73 : vector<8x128xf32>
    %81 = arith.addf %72, %80 : vector<8x128xf32>
    %82 = arith.addf %81, %79 : vector<8x128xf32>
    %c0_8 = arith.constant 0 : index
    %83 = memref.load %arg1[%c0_8] : memref<1xf32, #tpu.memory_space<smem>>
    %84 = vector.broadcast %83 : f32 to vector<1x128xf32>
    %85 = arith.addf %84, %11 : vector<1x128xf32>
    %cst_9 = arith.constant dense<0.000000e+00> : vector<128xf32>
    %86 = vector.multi_reduction <add>, %82, %cst_9 [0] : vector<8x128xf32> to vector<128xf32>
    %87 = vector.shape_cast %86 : vector<128xf32> to vector<1x128xf32>
    %88 = arith.addf %85, %87 : vector<1x128xf32>
    %cst_10 = arith.constant dense<0.000000e+00> : vector<128xf32>
    %89 = vector.multi_reduction <add>, %76, %cst_10 [0] : vector<8x128xf32> to vector<128xf32>
    %90 = vector.shape_cast %89 : vector<128xf32> to vector<1x128xf32>
    %c0_11 = arith.constant 0 : index
    %c0_12 = arith.constant 0 : index
    %91 = vector.load %arg5[%c0_11, %c0_12] : memref<3x128xf32, #tpu.memory_space<vmem>>, vector<1x128xf32>
    tpu.vector_store %arg5[%c0_11, %c0_12], %88 {strides = array<i32>} : memref<3x128xf32, #tpu.memory_space<vmem>>, vector<1x128xf32>,
    %c1 = arith.constant 1 : index
    %c0_13 = arith.constant 0 : index
    %92 = vector.load %arg5[%c1, %c0_13] : memref<3x128xf32, #tpu.memory_space<vmem>>, vector<1x128xf32>
    tpu.vector_store %arg5[%c1, %c0_13], %14 {strides = array<i32>} : memref<3x128xf32, #tpu.memory_space<vmem>>, vector<1x128xf32>,
    %c2 = arith.constant 2 : index
    %c0_14 = arith.constant 0 : index
    %93 = vector.load %arg5[%c2, %c0_14] : memref<3x128xf32, #tpu.memory_space<vmem>>, vector<1x128xf32>
    tpu.vector_store %arg5[%c2, %c0_14], %90 {strides = array<i32>} : memref<3x128xf32, #tpu.memory_space<vmem>>, vector<1x128xf32>,
    return
  }
  func.func @transform_0(%arg0: i32) -> i32 {
    %c0_i32 = arith.constant 0 : i32
    %c0_i32_0 = arith.constant 0 : i32
    return %c0_i32 : i32
  }
  func.func @transform_1(%arg0: i32) -> (i32, i32) {
    %c0_i32 = arith.constant 0 : i32
    %c0_i32_0 = arith.constant 0 : i32
    %c0_i32_1 = arith.constant 0 : i32
    return %c0_i32, %c0_i32_0 : i32, i32
  }
  func.func @transform_2(%arg0: i32) -> (i32, i32) {
    %c0_i32 = arith.constant 0 : i32
    %c0_i32_0 = arith.constant 0 : i32
    return %arg0, %c0_i32 : i32, i32
  }
  func.func @transform_3(%arg0: i32) -> (i32, i32) {
    %c0_i32 = arith.constant 0 : i32
    %c0_i32_0 = arith.constant 0 : i32
    return %arg0, %c0_i32 : i32, i32
  }
  func.func @transform_4(%arg0: i32) -> (i32, i32) {
    %c0_i32 = arith.constant 0 : i32
    %c0_i32_0 = arith.constant 0 : i32
    return %c0_i32, %arg0 : i32, i32
  }
}

</mosaic_0001>

<bundles_post_ra>
// kernel: tpu_custom_call.1
= control target key start
LH: loop header
LB: loop body
LE: loop exit
PB: predicated region body
PF: predicated region fallthrough
CT: control target
= control target key end

     0   :  { %s1383_s0 = inlined_call_operand.<no memory space> [shape: f32[1], index: 0, kind: input, shape index: {}]   ;;  %s1384_s1 = inlined_call_operand.vmem [shape: f32[64,64], index: 1, kind: input, shape index: {}]   ;;  %s1385_s2 = inlined_call_operand.vmem [shape: f32[1024,8], index: 2, kind: input, shape index: {}]   ;;  %s1386_s3 = inlined_call_operand.vmem [shape: f32[1024,64], index: 3, kind: input, shape index: {}]   ;;  %s1387_s4 = inlined_call_operand.hbm [shape: f32[3,1024], index: 4, kind: output, shape index: {}]  }
   0x1   :  { %9 = sst [smem:[#allocation2]] %s1383_s0 }
   0x2   :  { %10 = vsyncpa [#allocation4], 0 }
   0x3   :  { %12 = vsyncpa [#allocation4 + $0x1], 0  ;;  %s1138_s17 = smov 0   ;;  %s1140_s18 = smov 0  }
   0x4   :  { %s1142_s19 = smov 0   ;;  %s1144_s20 = smov 0  }
   0x5 LB: > { %s1159_s0 = sadd.s32 4294967295, %s1104_s20   ;;  %s745_s21 = sadd.s32 4294967294, %s1104_s20   ;;  %s1104_s20 = sphi %s1144_s20, %s1397_s20   ;;  %s1100_s19 = sphi %s1142_s19, %s1396_s19   ;;  %s1096_s18 = sphi %s1140_s18, %s1395_s18   ;;  %s1092_s17 = sphi %s1138_s17, %s1394_s17  }
   0x6   : > { %s1163_s22 = sadd.s32 1, %s1104_s20   ;;  %s119_s23 = sadd.s32 1, %s1100_s19 }
   0x7   : > { %s116_s24 = ssub.s32 %s1104_s20, %s1163_s22  ;;  %p129_p0 = scmp.ne.s32.totalorder %s1100_s19, %s1096_s18 }
   0x8   : > { %p117_p1 = scmp.eq.s32.totalorder %s116_s24, 0  ;;  %p130_p2 = scmp.eq.s32.totalorder %s1159_s0, 7 }
   0x9   : > { %p135_p3 = scmp.ne.s32.totalorder %s1096_s18, %s1092_s17  ;;  %p136_p4 = scmp.eq.s32.totalorder %s745_s21, 7 }
   0xa   : > { %s1174_s25 = scalar_select %p117_p1, %s1100_s19, %s119_s23  }
   0xb   : > { %p1176_p5 = por %p130_p2, %p129_p0  ;;  %p1180_p6 = por %p136_p4, %p135_p3 }
   0xc   : > { %p748_p7 = scmp.ge.s32.totalorder %s1104_s20, 1  ;;  %p178_p8 = scmp.lt.s32.totalorder %s1104_s20, 9 }
   0xe   : > { %p179_p9 = pnand %p748_p7, %p178_p8 }
   0xf   : > { %s750_s28 = sshll.u32 (!%p179_p9), %s1159_s0, 4  ;;  %vm261_vm0 = vcmask (!%p179_p9), 523264   ;;  %v221_v0 = vld [vmem:[%s1384_s1] sm:$0xff] (!%p179_p9)  ;;  %v1106_v1 = vmov (!%p179_p9), 0.0|0.0   ;;  %vm1107_vm1 = vmmov (!%p179_p9), 0   ;;  %v1108_v2 = vmov (!%p179_p9), 0.0  }
  0x10   : > { %182 = sbr.rel (%p179_p9) target bundleno = 358 (0x166), region = 36  ;;  %p210_p10 = scmp.lt.s32.totalorder (!%p179_p9), %s750_s28, 127  ;;  %968 = vmatprep.subr.bf16.mxu1 (!%p179_p9), %v1106_v1  ;;  %873 = vmatprep.mubr.msk.f32.mxu0 (!%p179_p9), %vm261_vm0, %v221_v0  ;;  %vm1205_vm2 = vmpackc.low (!%p179_p9), %vm261_vm0, %vm261_vm0  ;;  %vm446_vm3 = vcmask (!%p179_p9), 64512   ;;  %v439_v52 = vlaneseq (!%p179_p9)  ;;  %v222_v56 = vld [vmem:[%s1384_s1 + $0x8] sm:$0xff] (!%p179_p9)  ;;  %v223_v57 = vld [vmem:[%s1384_s1 + $0x10] sm:$0xff] (!%p179_p9) }
  0x11   : > { %917 = vmatprep.mubr.msk.f32.mxu1 (!%p179_p9), %vm1107_vm1, %v1108_v2  ;;  %vm1217_vm4 = vmpackc.low (!%p179_p9), %vm446_vm3, %vm446_vm3  ;;  %v224_v59 = vld [vmem:[%s1384_s1 + $0x18] sm:$0xff] (!%p179_p9)  ;;  %v225_v60 = vld [vmem:[%s1384_s1 + $0x20] sm:$0xff] (!%p179_p9)  ;;  %s641_s10 = sld [smem:[#allocation2]] (!%p179_p9)  ;;  %s797_s12 = sshll.u32 (!%p179_p9), %s1159_s0, 6 }
  0x12   : > { %v440_v54 = vshrl.u32 (!%p179_p9), %v439_v52, 7  ;;  %v442_v55 = vand.u32 (!%p179_p9), 127, %v439_v52  ;;  %v226_v61 = vld [vmem:[%s1384_s1 + $0x28] sm:$0xff] (!%p179_p9)  ;;  %v227_v62 = vld [vmem:[%s1384_s1 + $0x30] sm:$0xff] (!%p179_p9)  ;;  %v228_v63 = vld [vmem:[%s1384_s1 + $0x38] sm:$0xff] (!%p179_p9)  ;;  %s1339_s16 = scalar_lea.hbm (!%p179_p9), %s1387_s4, %s797_s12  ;;  %s1109_s0 = smov (!%p179_p9), [#allocation3]  }
  0x13   : > { %s1046_s24 = sshll.u32 (!%p179_p9), %s1109_s0, 4  ;;  %s1047_s24 = int_to_ptr.vmem [resolvable:$false] %s1046_s24 }
  0x14   : > { %vm443_vm5 = vcmp.eq.s32.totalorder (!%p179_p9), %v440_v54, %v442_v55 }
  0x15   : > { %v778_v58 = vsel (!%p179_p9), %vm443_vm5, 1.0, %v1108_v2 }
  0x17   : > { %s1399_s28 = smov (!%p210_p10, %s750_s28), 127 }
  0x18   : > { %s751_s5 = sshll.u32 %s1399_s28, 3  ;;  %s1048_s28 = scalar_lea.vmem %s1047_s24, 128 }
  0x19   : > { %s1196_s8 = scalar_lea.vmem %s1385_s2, %s751_s5  ;;  %s1201_s11 = scalar_lea.vmem %s1386_s3, %s751_s5 }
  0x1a   : > { %v245_v4 = vld [vmem:[%s1201_s11] sm:$0xff]  ;;  %v246_v5 = vld [vmem:[%s1201_s11 + $0x8] sm:$0xff]  ;;  %v247_v6 = vld [vmem:[%s1201_s11 + $0x10] sm:$0xff] }
  0x1b   : > { %v920_v7 = vpack.c.bf16 %v246_v5, %v245_v4  ;;  %v248_v8 = vld [vmem:[%s1201_s11 + $0x18] sm:$0xff]  ;;  %v229_v10 = vld [vmem:[%s1196_s8] sm:$0xff]  ;;  %v230_v11 = vld [vmem:[%s1196_s8 + $0x8] sm:$0xff] }
  0x1c   : > { %v926_v9 = vpack.c.bf16 %v248_v8, %v247_v6  ;;  %v969_v13 = vpack.c.bf16 %v230_v11, %v229_v10  ;;  %v249_v14 = vld [vmem:[%s1201_s11 + $0x20] sm:$0xff]  ;;  %v250_v15 = vld [vmem:[%s1201_s11 + $0x28] sm:$0xff]  ;;  %v231_v16 = vld [vmem:[%s1196_s8 + $0x10] sm:$0xff] }
  0x1d   : > { %922 = vmatprep.subr.msk.bf16.mxu0 %vm1205_vm2, %v920_v7  ;;  %v232_v17 = vld [vmem:[%s1196_s8 + $0x18] sm:$0xff]  ;;  %v932_v18 = vpack.c.bf16 %v250_v15, %v249_v14  ;;  %v251_v20 = vld [vmem:[%s1201_s11 + $0x30] sm:$0xff]  ;;  %v233_v22 = vld [vmem:[%s1196_s8 + $0x20] sm:$0xff] }
  0x1e   : > { %925 = vmatpush3.bf16.xpose.msk.msra.mxu0 %vm1205_vm2, %v920_v7  ;;  %971 = vmatpush3.bf16.xpose.msk.msra.mxu1 %vm1217_vm4, %v969_v13  ;;  %v973_v19 = vpack.c.bf16 %v232_v17, %v231_v16  ;;  %v252_v21 = vld [vmem:[%s1201_s11 + $0x38] sm:$0xff]  ;;  %v234_v23 = vld [vmem:[%s1196_s8 + $0x28] sm:$0xff]  ;;  %v253_v26 = vld [vmem:[%s1201_s11 + $0x40] sm:$0xff] }
  0x1f   : > { %928 = vmatprep.subr.msk.bf16.mxu0 %vm1205_vm2, %v926_v9  ;;  %972 = vmatprep.subr.bf16.mxu1 %v1106_v1  ;;  %v938_v24 = vpack.c.bf16 %v252_v21, %v251_v20  ;;  %v977_v25 = vpack.c.bf16 %v234_v23, %v233_v22  ;;  %v254_v27 = vld [vmem:[%s1201_s11 + $0x48] sm:$0xff]  ;;  %v235_v28 = vld [vmem:[%s1196_s8 + $0x30] sm:$0xff]  ;;  %v236_v29 = vld [vmem:[%s1196_s8 + $0x38] sm:$0xff] }
  0x20   : > { %v944_v30 = vpack.c.bf16 %v254_v27, %v253_v26  ;;  %v981_v31 = vpack.c.bf16 %v236_v29, %v235_v28  ;;  %v255_v32 = vld [vmem:[%s1201_s11 + $0x50] sm:$0xff]  ;;  %v256_v33 = vld [vmem:[%s1201_s11 + $0x58] sm:$0xff]  ;;  %v237_v34 = vld [vmem:[%s1196_s8 + $0x40] sm:$0xff] }
  0x21   : > { %v238_v35 = vld [vmem:[%s1196_s8 + $0x48] sm:$0xff]  ;;  %v950_v36 = vpack.c.bf16 %v256_v33, %v255_v32  ;;  %v257_v38 = vld [vmem:[%s1201_s11 + $0x60] sm:$0xff]  ;;  %v239_v40 = vld [vmem:[%s1196_s8 + $0x50] sm:$0xff] }
  0x22   : > { %v985_v37 = vpack.c.bf16 %v238_v35, %v237_v34  ;;  %v258_v39 = vld [vmem:[%s1201_s11 + $0x68] sm:$0xff]  ;;  %v240_v41 = vld [vmem:[%s1196_s8 + $0x58] sm:$0xff]  ;;  %v259_v44 = vld [vmem:[%s1201_s11 + $0x70] sm:$0xff] }
  0x23   : > { %v956_v42 = vpack.c.bf16 %v258_v39, %v257_v38  ;;  %v989_v43 = vpack.c.bf16 %v240_v41, %v239_v40  ;;  %v260_v45 = vld [vmem:[%s1201_s11 + $0x78] sm:$0xff]  ;;  %v241_v46 = vld [vmem:[%s1196_s8 + $0x60] sm:$0xff]  ;;  %v242_v47 = vld [vmem:[%s1196_s8 + $0x68] sm:$0xff] }
  0x24   : > { %v962_v48 = vpack.c.bf16 %v260_v45, %v259_v44  ;;  %v993_v49 = vpack.c.bf16 %v242_v47, %v241_v46  ;;  %v243_v50 = vld [vmem:[%s1196_s8 + $0x70] sm:$0xff]  ;;  %v244_v51 = vld [vmem:[%s1196_s8 + $0x78] sm:$0xff]  ;;  %s206_s8 = sand.u32 1, %s1096_s18  }
  0x25   : > { %v997_v53 = vpack.c.bf16 %v244_v51, %v243_v50  ;;  %s749_s9 = sshll.u32 %s206_s8, 2  ;;  %s661_s21 = scalar_lea.sflag [#allocation4], %s206_s8 }
  0x26   : > { %931 = vmatpush3.bf16.xpose.msk.msra.mxu0 %vm1205_vm2, %v926_v9  ;;  %975 = vmatpush3.bf16.xpose.msk.msra.mxu1 %vm1217_vm4, %v973_v19  ;;  %s208_s11 = scalar_lea.vmem [#allocation3], %s749_s9 }
  0x27   : > { %934 = vmatprep.subr.msk.bf16.mxu0 %vm1205_vm2, %v932_v18  ;;  %976 = vmatprep.subr.bf16.mxu1 %v1106_v1  ;;  %s674_s13 = sshll.u32 %s208_s11, 4  ;;  %s1341_s13 = int_to_ptr.vmem [resolvable:$true] %s674_s13 }
  0x28   : > { %s1042_s23 = scalar_lea.vmem %s1341_s13, 64  ;;  %p1049_p0 = scmp.lt.s32.totalorder %s1341_s13, %s1047_s24 }
  0x29   : > { %p1043_p11 = scmp.ne.s32.totalorder %s1341_s13, %s1042_s23  ;;  %p1050_p1 = scmp.lt.s32.totalorder %s1048_s28, %s1042_s23 }
  0x2b   : > { %p1044_p12 = pnand %p1043_p11, %p1176_p5  ;;  %p1051_p2 = por %p1050_p1, %p1049_p0 }
  0x2d   : > { %p1045_p13 = pneg %p1044_p12 }
  0x2e   : > { %937 = vmatpush3.bf16.xpose.msk.msra.mxu0 %vm1205_vm2, %v932_v18  ;;  %979 = vmatpush3.bf16.xpose.msk.msra.mxu1 %vm1217_vm4, %v977_v25 }
  0x2f   : > { %940 = vmatprep.subr.msk.bf16.mxu0 %vm1205_vm2, %v938_v24  ;;  %980 = vmatprep.subr.bf16.mxu1 %v1106_v1  ;;  %p1052_p3 = pnand %p1051_p2, %p1045_p13 }
  0x36   : > { %943 = vmatpush3.bf16.xpose.msk.msra.mxu0 %vm1205_vm2, %v938_v24  ;;  %983 = vmatpush3.bf16.xpose.msk.msra.mxu1 %vm1217_vm4, %v981_v31 }
  0x37   : > { %946 = vmatprep.subr.msk.bf16.mxu0 %vm1205_vm2, %v944_v30  ;;  %984 = vmatprep.subr.bf16.mxu1 %v1106_v1 }
  0x3e   : > { %949 = vmatpush3.bf16.xpose.msk.msra.mxu0 %vm1205_vm2, %v944_v30  ;;  %987 = vmatpush3.bf16.xpose.msk.msra.mxu1 %vm1217_vm4, %v985_v37 }
  0x3f   : > { %952 = vmatprep.subr.msk.bf16.mxu0 %vm1205_vm2, %v950_v36  ;;  %988 = vmatprep.subr.bf16.mxu1 %v1106_v1 }
  0x46   : > { %955 = vmatpush3.bf16.xpose.msk.msra.mxu0 %vm1205_vm2, %v950_v36  ;;  %991 = vmatpush3.bf16.xpose.msk.msra.mxu1 %vm1217_vm4, %v989_v43 }
  0x47   : > { %958 = vmatprep.subr.msk.bf16.mxu0 %vm1205_vm2, %v956_v42  ;;  %992 = vmatprep.subr.bf16.mxu1 %v1106_v1 }
  0x4e   : > { %961 = vmatpush3.bf16.xpose.msk.msra.mxu0 %vm1205_vm2, %v956_v42  ;;  %995 = vmatpush3.bf16.xpose.msk.msra.mxu1 %vm1217_vm4, %v993_v49 }
  0x4f   : > { %964 = vmatprep.subr.msk.bf16.mxu0 %vm1205_vm2, %v962_v48  ;;  %996 = vmatprep.subr.bf16.mxu1 %v1106_v1 }
  0x56   : > { %967 = vmatpush3.bf16.xpose.msk.msra.mxu0 %vm1205_vm2, %v962_v48  ;;  %999 = vmatpush3.bf16.xpose.msk.msra.mxu1 %vm1217_vm4, %v997_v53 }
  0x5d   : > { %874 = vmatmul.mubr.msk.f32.vlgmr.msra.gmra.mrb[0].mxu0 %vm261_vm0, %v222_v56  ;;  %918 = vmatmul.mubr.msk.f32.vlgmr.msra.gmra.mrb[0].mxu1 %vm446_vm3, %v778_v58 }
  0x5e   : > { %876 = vmatprep.mubr.msk.f32.mxu0 %vm261_vm0, %v223_v57 }
  0x61   : > { %877 = vmatmul.mubr.msk.f32.gmra.mrb[2].mxu0 %vm261_vm0, %v224_v59 }
  0x62   : > { %879 = vmatprep.mubr.msk.f32.mxu0 %vm261_vm0, %v225_v60 }
  0x65   : > { %880 = vmatmul.mubr.msk.f32.gmra.mrb[4].mxu0 %vm261_vm0, %v226_v61 }
  0x66   : > { %882 = vmatprep.mubr.msk.f32.mxu0 %vm261_vm0, %v227_v62 }
  0x69   : > { %883 = vmatmul.mubr.msk.f32.gmra.mrb[6].mxu0 %vm261_vm0, %v228_v63 }
 0x130   : > { %v875_v0 = vpop.f32.mrb[0].mxu0  ;;  %v564_v3 = vpop.f32.mrb[0].mxu1 }
 0x131   : > { %v584_v1 = vmul.f32 %v875_v0, %v875_v0  ;;  %v400_v2 = vpop.f32.mrb[1].mxu0  ;;  %v919_v7 = vpop.f32.mrb[1].mxu1  ;;  %v574_v8 = vmul.f32 %v564_v3, %v564_v3  ;;  %v568_v13 = vrot.slane %v564_v3, 4 }
 0x132   : > { %v581_v4 = vmul.f32 %v400_v2, %v400_v2  ;;  %v582_v5 = vmul.f32 %v875_v0, %v400_v2  ;;  %v583_v6 = vadd.f32 %v875_v0, %v400_v2 }
 0x133   : > { %v575_v14 = vrot.slane %v574_v8, 4  ;;  %v569_v28 = vadd.f32 %v568_v13, %v564_v3 }
 0x134   : > { %v585_v9 = vmul.f32 %v584_v1, %v581_v4  ;;  %v586_v10 = vadd.f32 %v584_v1, %v581_v4  ;;  %v878_v11 = vpop.f32.mrb[2].mxu0 }
 0x135   : > { %v410_v12 = vpop.f32.mrb[3].mxu0  ;;  %v601_v19 = vmul.f32 %v878_v11, %v878_v11  ;;  %v576_v29 = vadd.f32 %v575_v14, %v574_v8 }
 0x136   : > { %v587_v15 = vmul.f32 %v582_v5, %v410_v12  ;;  %v588_v16 = vmul.f32 %v583_v6, %v410_v12  ;;  %v590_v17 = vadd.f32 %v583_v6, %v410_v12  ;;  %v591_v18 = vmul.f32 %v410_v12, %v410_v12 }
 0x138   : > { %v589_v20 = vadd.f32 %v588_v16, %v582_v5  ;;  %v592_v21 = vmul.f32 %v591_v18, %v585_v9  ;;  %v593_v22 = vmul.f32 %v591_v18, %v586_v10  ;;  %v595_v23 = vadd.f32 %v591_v18, %v586_v10  ;;  %v881_v24 = vpop.f32.mrb[4].mxu0 }
 0x139   : > { %v598_v25 = vmul.f32 %v878_v11, %v590_v17  ;;  %v420_v26 = vpop.f32.mrb[5].mxu0  ;;  %v600_v27 = vadd.f32 %v878_v11, %v590_v17  ;;  %v623_v40 = vmul.f32 %v881_v24, %v881_v24  ;;  %v577_v5 = vrot.slane %v576_v29, 2 }
 0x13a   : > { %v594_v30 = vadd.f32 %v593_v22, %v585_v9  ;;  %v596_v31 = vmul.f32 %v878_v11, %v589_v20  ;;  %v604_v32 = vmul.f32 %v601_v19, %v595_v23  ;;  %v606_v33 = vadd.f32 %v601_v19, %v595_v23 }
 0x13b   : > { %v599_v34 = vadd.f32 %v598_v25, %v589_v20  ;;  %v609_v35 = vmul.f32 %v600_v27, %v420_v26  ;;  %v611_v36 = vadd.f32 %v600_v27, %v420_v26  ;;  %v612_v37 = vmul.f32 %v420_v26, %v420_v26 }
 0x13c   : > { %v597_v38 = vadd.f32 %v596_v31, %v587_v15  ;;  %v602_v39 = vmul.f32 %v601_v19, %v594_v30  ;;  %v605_v41 = vadd.f32 %v604_v32, %v594_v30  ;;  %v884_v42 = vpop.f32.mrb[6].mxu0  ;;  %v570_v9 = vrot.slane %v569_v28, 2 }
 0x13d   : > { %v607_v43 = vmul.f32 %v599_v34, %v420_v26  ;;  %v615_v44 = vmul.f32 %v612_v37, %v606_v33  ;;  %v617_v45 = vadd.f32 %v612_v37, %v606_v33  ;;  %v430_v46 = vpop.f32.mrb[7].mxu0  ;;  %v610_v47 = vadd.f32 %v609_v35, %v599_v34 }
 0x13e   : > { %v603_v48 = vadd.f32 %v602_v39, %v592_v21  ;;  %v613_v49 = vmul.f32 %v612_v37, %v605_v41  ;;  %v620_v50 = vmul.f32 %v881_v24, %v611_v36  ;;  %v622_v51 = vadd.f32 %v881_v24, %v611_v36 }
 0x13f   : > { %v608_v52 = vadd.f32 %v607_v43, %v597_v38  ;;  %v616_v53 = vadd.f32 %v615_v44, %v605_v41  ;;  %v618_v54 = vmul.f32 %v881_v24, %v610_v47  ;;  %v626_v55 = vmul.f32 %v623_v40, %v617_v45 }
 0x140   : > { %v614_v56 = vadd.f32 %v613_v49, %v603_v48  ;;  %v621_v57 = vadd.f32 %v620_v50, %v610_v47  ;;  %v630_v58 = vmul.f32 %v622_v51, %v430_v46  ;;  %v632_v59 = vadd.f32 %v622_v51, %v430_v46 }
 0x141   : > { %v619_v60 = vadd.f32 %v618_v54, %v608_v52  ;;  %v624_v61 = vmul.f32 %v623_v40, %v616_v53  ;;  %v627_v62 = vadd.f32 %v626_v55, %v616_v53  ;;  %v633_v63 = vmul.f32 %v430_v46, %v430_v46 }
 0x142   : > { %v628_v0 = vmul.f32 %v621_v57, %v430_v46  ;;  %v631_v1 = vadd.f32 %v630_v58, %v621_v57  ;;  %v638_v2 = vmul.f32 %v884_v42, %v632_v59  ;;  %v578_v11 = vadd.f32 %v577_v5, %v576_v29 }
 0x143   : > { %v625_v3 = vadd.f32 %v624_v61, %v614_v56  ;;  %v634_v4 = vmul.f32 %v633_v63, %v627_v62  ;;  %v571_v16 = vadd.f32 %v570_v9, %v569_v28  ;;  %v642_v29 = vstv %s641_s10 }
 0x144   : > { %v629_v6 = vadd.f32 %v628_v0, %v619_v60  ;;  %v636_v7 = vmul.f32 %v884_v42, %v631_v1  ;;  %v639_v8 = vadd.f32 %v638_v2, %v631_v1  ;;  %v579_v14 = vrot.slane %v578_v11, 1 }
 0x145   : > { %v635_v10 = vadd.f32 %v634_v4, %v625_v3  ;;  %v572_v22 = vrot.slane %v571_v16, 1 }
 0x146   : > { %v637_v12 = vadd.f32 %v636_v7, %v629_v6  ;;  %v580_v18 = vadd.f32 %v579_v14, %v578_v11 }
 0x147   : > { %v651_v13 = vrot.slane %v635_v10, 4  ;;  %v573_v27 = vadd.f32 %v572_v22, %v571_v16 }
 0x148   : > { %v640_v15 = vadd.f32 %v639_v8, %v637_v12  ;;  %658 = vst [vmem:[%s208_s11 + $0x1] sm:$0x1] %v580_v18 }
 0x149   : > { %v652_v17 = vadd.f32 %v651_v13, %v635_v10  ;;  %v643_v31 = vadd.f32 %v642_v29, %v573_v27 }
 0x14a   : > { %v644_v19 = vrot.slane %v640_v15, 4 }
 0x14b   : > { %v653_v20 = vrot.slane %v652_v17, 2 }
 0x14c   : > { %v645_v21 = vadd.f32 %v644_v19, %v640_v15 }
 0x14d   : > { %v654_v23 = vadd.f32 %v653_v20, %v652_v17 }
 0x14e   : > { %v646_v24 = vrot.slane %v645_v21, 2 }
 0x14f   : > { %v655_v25 = vrot.slane %v654_v23, 1 }
 0x150   : > { %v647_v26 = vadd.f32 %v646_v24, %v645_v21 }
 0x151   : > { %v656_v30 = vadd.f32 %v655_v25, %v654_v23 }
 0x152   : > { %v648_v28 = vrot.slane %v647_v26, 1 }
 0x153   : > { %659 = vst [vmem:[%s208_s11 + $0x2] sm:$0x1] %v656_v30 }
 0x154   : > { %v649_v32 = vadd.f32 %v648_v28, %v647_v26 }
 0x156   : > { %v650_v33 = vadd.f32 %v649_v32, %v643_v31 }
 0x158   : > { %657 = vst [vmem:[%s208_s11] sm:$0x1] %v650_v33 }
 0x159   : > { %1055 = shalt.err (!%p1052_p3)
}
 0x15a   : > { %s1056_s29 = scalar_lea.hbm %s1339_s16, 64  ;;  %s1060_s6 = scalar_lea.hbm %s1387_s4, 512 }
 0x15b   : > { %p1057_p4 = scmp.ne.s32.totalorder %s1339_s16, %s1056_s29  ;;  %p1061_p9 = scmp.lt.u32.totalorder %s1339_s16, %s1387_s4 }
 0x15c   : > { %p1062_p10 = scmp.lt.u32.totalorder %s1060_s6, %s1056_s29  ;;  %p1064_p12 = scmp.lt.u32.totalorder %s1056_s29, %s1339_s16 }
 0x15d   : > { %p1058_p7 = pnand %p1057_p4, %p1176_p5 }
 0x15e   : > { %p1063_p11 = por %p1062_p10, %p1061_p9 }
 0x15f   : > { %p1059_p8 = pneg %p1058_p7 }
 0x160   : > { %p1065_p13 = por %p1064_p12, %p1063_p11 }
 0x162   : > { %p1066_p0 = pnand %p1065_p13, %p1059_p8 }
 0x164   : > { %1069 = shalt.err (!%p1066_p0)
}
 0x165   : > { %1000 = dma.vmem_to_hbm [thread:$0]  (%p1176_p5), %s1341_s13, 64, %s1339_s16, %s661_s21  }
 0x166 PF: > { %p1006_p1 = scmp.ge.s32.totalorder %s1104_s20, 2  ;;  %s686_s9 = sand.u32 1, %s1092_s17  }
 0x167   : > { %s687_s10 = scalar_lea.sflag [#allocation4], %s686_s9 }
 0x168   : > { %p1003_p2 = pnand %p1006_p1, %p1180_p6 }
 0x16a   : > { %1087 = dma.done.wait (!%p1003_p2), %s687_s10, 64  }
 0x16b   : > { %1089 = vsyncadd (!%p1003_p2), %s687_s10, 4294967232  ;;  %p15_p3 = scmp.ge.s32.totalorder %s1163_s22, 10   ;;  %s1394_s17 = smov %s1096_s18 }
 0x16c   : > { %s1395_s18 = smov %s1100_s19  ;;  %s1396_s19 = smov %s1174_s25 }
 0x16d   : > { %s1397_s20 = smov %s1163_s22  ;;  %17 = sbr.rel (!%p15_p3) target bundleno = 5 (0x5), region = 74 }
 0x174   :  { %692 = vsyncpa [#allocation4], 1 }
 0x175   :  { %694 = vsyncpa [#allocation4 + $0x1], 1 }

</bundles_post_ra>
